<compile_context>
chip_gen: v6e
topology: v6e:2x2x1
jax: 0.10.0
libtpu: 0.0.40
codegen_flags: <defaults>
</compile_context>

<pallas_src>
import functools

import jax
import jax.numpy as jnp
from jax.experimental import pallas as pl
from jax.experimental.pallas import tpu as pltpu


_TARGET_BLOCK_BYTES = 2 * 1024 * 1024   # per-array block; x3 arrays x2 buffers ~ 12 MiB
_MAX_LANE_TILE = 2048                   # 512-2048 lanes ~ HBM-roofline sweet spot
_MAX_CHAN_TILE = 128


def _sublane(dtype) -> int:
    """Sublane tile for a dtype: 8 for 4-byte, 16 for 2-byte, 32 for 1-byte."""
    return max(8, 32 // jnp.dtype(dtype).itemsize)


def _pick_tile(dim: int, unit: int, cap: int) -> int:
    """Largest multiple of `unit` that divides `dim`, capped at `cap`.

    Falls back to the full extent (`dim`) when `dim` is not a multiple of
    `unit` -- a full-extent block is always a legal block shape.
    """
    if dim % unit != 0:
        return dim
    cap = max(unit, min(dim, (cap // unit) * unit))
    best = unit
    t = unit
    while t <= cap:
        if dim % t == 0:
            best = t
        t += unit
    return best


def _glu_split_kernel(x1_ref, x2_ref, o_ref):
    """Fast path: the two channel halves arrive as separate, aligned blocks."""
    x1 = x1_ref[...].astype(jnp.float32)
    x2 = x2_ref[...].astype(jnp.float32)
    o_ref[...] = (x1 * jax.nn.sigmoid(x2)).astype(o_ref.dtype)


def _glu_fused_kernel(x_ref, o_ref, *, half):
    """Fallback path: full channel extent per block, split inside the kernel."""
    x = x_ref[...].astype(jnp.float32)
    x1 = x[:half, :]
    x2 = x[half:, :]
    o_ref[...] = (x1 * jax.nn.sigmoid(x2)).astype(o_ref.dtype)


def glu(x):
    """GLU over the channel dim of NCHW: x[:, :C//2] * sigmoid(x[:, C//2:])."""
    N, C, H, W = x.shape
    assert C % 2 == 0, "channel dim must be even for GLU"
    half = C // 2
    hw = H * W
    itemsize = jnp.dtype(x.dtype).itemsize
    sub = _sublane(x.dtype)

    # Glue: flatten spatial dims so the last (lane) axis is H*W.
    x_flat = x.reshape(N, C, hw)
    out_shape = jax.ShapeDtypeStruct((N, half, hw), x.dtype)

    if half % sub == 0:
        # ---- aligned fast path: tile channels and lanes, dual input specs ----
        tc = _pick_tile(half, sub, _MAX_CHAN_TILE)
        lane_cap = min(_MAX_LANE_TILE,
                       max(128, _TARGET_BLOCK_BYTES // (tc * itemsize)))
        tl = _pick_tile(hw, 128, lane_cap)
        c_blocks = half // tc
        grid = (N, c_blocks, pl.cdiv(hw, tl))

        blk = (pl.Squeezed(), tc, tl)
        in_specs = [
            pl.BlockSpec(blk, lambda b, c, l: (b, c, l)),             # x1 half
            pl.BlockSpec(blk, lambda b, c, l: (b, c + c_blocks, l)),  # x2 half
        ]
        out_specs = pl.BlockSpec(blk, lambda b, c, l: (b, c, l))
        kernel = _glu_split_kernel
        operands = (x_flat, x_flat)  # same array; specs read disjoint halves
    else:
        # ---- fallback (sublane-misaligned half): full-C blocks, split inside ----
        lane_cap = min(_MAX_LANE_TILE,
                       max(128, _TARGET_BLOCK_BYTES // (C * itemsize)))
        tl = _pick_tile(hw, 128, lane_cap)
        grid = (N, pl.cdiv(hw, tl))

        in_specs = [pl.BlockSpec((pl.Squeezed(), C, tl), lambda b, l: (b, 0, l))]
        out_specs = pl.BlockSpec((pl.Squeezed(), half, tl), lambda b, l: (b, 0, l))
        kernel = functools.partial(_glu_fused_kernel, half=half)
        operands = (x_flat,)

    out_flat = pl.pallas_call(
        kernel,
        out_shape=out_shape,
        grid_spec=pltpu.PrefetchScalarGridSpec(
            num_scalar_prefetch=0,
            grid=grid,
            in_specs=in_specs,
            out_specs=out_specs,
        ),
        compiler_params=pltpu.CompilerParams(
            dimension_semantics=("parallel",) * len(grid)
        ),
    )(*operands)

    return out_flat.reshape(N, half, H, W)


if __name__ == "__main__":
    # Small test matching the module spec: NCHW with an even channel dim.
    key = jax.random.PRNGKey(0)
    x = jax.random.normal(key, (2, 4, 16, 16), dtype=jnp.float32)

    out = jax.block_until_ready(glu(x))

    half = x.shape[1] // 2
    ref = x[:, :half] * jax.nn.sigmoid(x[:, half:])
    assert out.shape == (2, 2, 16, 16)
    assert jnp.allclose(out, ref, atol=1e-6), "mismatch vs reference (fallback path)"

    # Exercise the sublane-aligned fast path (half % 8 == 0) as well.
    x_big = jax.random.normal(jax.random.PRNGKey(1), (2, 32, 16, 16),
                              dtype=jnp.float32)
    out_big = jax.block_until_ready(glu(x_big))
    ref_big = x_big[:, :16] * jax.nn.sigmoid(x_big[:, 16:])
    assert out_big.shape == (2, 16, 16, 16)
    assert jnp.allclose(out_big, ref_big, atol=1e-6), "mismatch vs reference (fast path)"

    print("KERNEL_OK")
</pallas_src>

<mosaic_0001>
module attributes {stable_mosaic.version = 11 : i64} {
  func.func @_glu_fused_kernel(%arg0: i32, %arg1: i32, %arg2: memref<1x4x256xf32, #tpu.memory_space<vmem>>, %arg3: memref<1x2x256xf32, #tpu.memory_space<vmem>>) attributes {dimension_semantics = [#tpu.dimension_semantics<parallel>, #tpu.dimension_semantics<parallel>], iteration_bounds = array<i64: 2, 1>, scalar_prefetch = 0 : i64, scratch_operands = 0 : i64, tpu.core_type = #tpu.core_type<tc>, window_params = [{transform_indices = @transform_0, window_bounds = array<i64: 1, 4, 256>}, {transform_indices = @transform_1, window_bounds = array<i64: 1, 2, 256>}]} {
    %c0 = arith.constant 0 : index
    %c0_0 = arith.constant 0 : index
    %c0_1 = arith.constant 0 : index
    %0 = vector.load %arg2[%c0, %c0_0, %c0_1] : memref<1x4x256xf32, #tpu.memory_space<vmem>>, vector<1x4x256xf32>
    %1 = vector.shape_cast %0 : vector<1x4x256xf32> to vector<4x256xf32>
    %2 = vector.extract_strided_slice %1 {offsets = [0, 0], sizes = [2, 256], strides = [1, 1]} : vector<4x256xf32> to vector<2x256xf32>
    %3 = vector.extract_strided_slice %1 {offsets = [2, 0], sizes = [2, 256], strides = [1, 1]} : vector<4x256xf32> to vector<2x256xf32>
    %4 = arith.negf %3 : vector<2x256xf32>
    %5 = math.exp %4 : vector<2x256xf32>
    %cst = arith.constant 1.000000e+00 : f32
    %6 = vector.broadcast %cst : f32 to vector<2x256xf32>
    %7 = arith.addf %6, %5 : vector<2x256xf32>
    %8 = arith.divf %6, %7 : vector<2x256xf32>
    %9 = arith.mulf %2, %8 : vector<2x256xf32>
    %c0_2 = arith.constant 0 : index
    %c0_3 = arith.constant 0 : index
    %c0_4 = arith.constant 0 : index
    %10 = vector.load %arg3[%c0_2, %c0_3, %c0_4] : memref<1x2x256xf32, #tpu.memory_space<vmem>>, vector<1x2x256xf32>
    %11 = vector.shape_cast %10 : vector<1x2x256xf32> to vector<2x256xf32>
    %12 = vector.shape_cast %9 : vector<2x256xf32> to vector<1x2x256xf32>
    tpu.vector_store %arg3[%c0_2, %c0_3, %c0_4], %12 {strides = array<i32>} : memref<1x2x256xf32, #tpu.memory_space<vmem>>, vector<1x2x256xf32>,
    return
  }
  func.func @transform_0(%arg0: i32, %arg1: i32) -> (i32, i32, i32) {
    %c0_i32 = arith.constant 0 : i32
    %c0_i32_0 = arith.constant 0 : i32
    return %arg0, %c0_i32, %arg1 : i32, i32, i32
  }
  func.func @transform_1(%arg0: i32, %arg1: i32) -> (i32, i32, i32) {
    %c0_i32 = arith.constant 0 : i32
    %c0_i32_0 = arith.constant 0 : i32
    return %arg0, %c0_i32, %arg1 : i32, i32, i32
  }
}

</mosaic_0001>

<bundles_post_ra>
// kernel: tpu_custom_call.1
= control target key start
LH: loop header
LB: loop body
LE: loop exit
PB: predicated region body
PF: predicated region fallthrough
CT: control target
= control target key end

     0   :  { %6 = vsyncpa [#allocation3], 0  ;;  %s619_s0 = inlined_call_operand.hbm [shape: f32[2,4,256], index: 0, kind: input, shape index: {}]   ;;  %s620_s1 = inlined_call_operand.hbm [shape: f32[2,2,256], index: 1, kind: output, shape index: {}]  }
   0x1   :  { %8 = vsyncpa [#allocation3 + $0x1], 0 }
   0x2   :  { %9 = vsyncpa [#allocation4], 0 }
   0x3   :  { %11 = vsyncpa [#allocation4 + $0x1], 0  ;;  %s484_s6 = smov 0   ;;  %s486_s7 = smov 0  }
   0x4   :  { %s488_s8 = smov 0   ;;  %s490_s9 = smov 0  }
   0x5   :  { %s492_s10 = smov 0   ;;  %s494_s11 = smov 0  }
   0x6 LB: > { %s276_s12 = sadd.s32 4294967295, %s470_s11   ;;  %s277_s13 = sadd.s32 4294967294, %s470_s11   ;;  %s470_s11 = sphi %s494_s11, %s17_s11   ;;  %s466_s10 = sphi %s492_s10, %s632_s10   ;;  %s462_s9 = sphi %s490_s9, %s631_s9   ;;  %s458_s8 = sphi %s488_s8, %s630_s8   ;;  %s454_s7 = sphi %s486_s7, %s629_s7   ;;  %s450_s6 = sphi %s484_s6, %s628_s6  }
   0x7   : > { %s29_s14 = sadd.s32 1, %s466_s10  ;;  %s38_s15 = sadd.s32 1, %s458_s8 }
   0x8   : > { %p31_p0 = scmp.ge.s32.totalorder %s29_s14, 2  ;;  %p45_p1 = scmp.ne.s32.totalorder %s458_s8, %s454_s7 }
   0x9   : > { %p46_p2 = scmp.eq.s32.totalorder %s470_s11, 0  ;;  %p51_p3 = scmp.ne.s32.totalorder %s454_s7, %s450_s6 }
   0xa   : > { %s634_s14 = smov (%p31_p0, %s29_s14), 0  ;;  %p52_p5 = scmp.eq.s32.totalorder %s276_s12, 0 }
   0xb   : > { %p525_p4 = por %p46_p2, %p45_p1  ;;  %s33_s17 = ssub.s32 %s466_s10, %s634_s14 }
   0xc   : > { %p77_p6 = scmp.eq.s32.totalorder %s276_s12, 1  ;;  %p36_p7 = scmp.eq.s32.totalorder %s33_s17, 0 }
   0xd   : > { %p531_p8 = por %p52_p5, %p51_p3  ;;  %p83_p10 = scmp.eq.s32.totalorder %s277_s13, 1 }
   0xe   : > { %p535_p9 = por %p77_p6, %p45_p1  ;;  %p308_p13 = scmp.lt.s32.totalorder %s470_s11, 2 }
   0xf   : > { %s540_s20 = scalar_select %p36_p7, %s458_s8, %s38_s15  }
  0x10   : > { %p542_p11 = por %p83_p10, %p51_p3  ;;  %s103_s22 = sand.u32 1, %s458_s8  }
  0x11   : > { %s280_s23 = sshll.u32 %s103_s22, 3  ;;  %s294_s24 = sshll.u32 %s466_s10, 7 }
  0x12   : > { %s624_s21 = scalar_select %p542_p11, 1, 0 }
  0x13   : > { %s115_s27 = scalar_lea.hbm %s619_s0, %s294_s24  ;;  %s107_s28 = scalar_lea.vmem [#allocation2], %s280_s23 }
  0x14   : > { %s117_s29 = sshll.u32 %s107_s28, 4  ;;  %p555_p0 = pnand %p308_p13, %p525_p4  ;;  %s118_s29 = int_to_ptr.vmem [resolvable:$true] %s117_s29 }
  0x15   : > { %p283_p1 = scmp.ge.s32.totalorder %s470_s11, 1  ;;  %p122_p2 = scmp.lt.s32.totalorder %s470_s11, 3 }
  0x16   : > { %s104_s2 = scalar_lea.sflag [#allocation3], %s103_s22  ;;  %p364_p3 = pneg %p555_p0 }
  0x17   : > { %s375_s3 = scalar_lea.vmem %s118_s29, 128  ;;  %s472_s4 = smov [#allocation2]  }
  0x18   : > { %p376_p5 = scmp.ne.s32.totalorder %s118_s29, %s375_s3  ;;  %s380_s5 = sshll.u32 %s472_s4, 4  ;;  %s381_s5 = int_to_ptr.vmem [resolvable:$false] %s380_s5 }
  0x19   : > { %s382_s12 = scalar_lea.vmem %s381_s5, 256  ;;  %p383_p10 = scmp.lt.s32.totalorder %s118_s29, %s381_s5 }
  0x1a   : > { %p378_p6 = pnand %p376_p5, %p364_p3  ;;  %p384_p12 = scmp.lt.s32.totalorder %s382_s12, %s375_s3 }
  0x1c   : > { %p379_p7 = pneg %p378_p6  ;;  %p385_p4 = por %p384_p12, %p383_p10 }
  0x1e   : > { %p386_p13 = pnand %p385_p4, %p379_p7 }
  0x20   : > { %389 = shalt.err (!%p386_p13)
}
  0x21   : > { %303 = dma.hbm_to_vmem [thread:$0]  (!%p555_p0), %s115_s27, 128, %s118_s29, %s104_s2  }
  0x22   : > { %p123_p11 = pnand %p283_p1, %p122_p2 }
  0x23   : > { %s570_s13 = sand.u32 (!%p123_p11), 1, %s454_s7  }
  0x24   : > { %126 = sbr.rel (%p123_p11) target bundleno = 92 (0x5c), region = 24  ;;  %s284_s15 = sshll.u32 (!%p123_p11), %s570_s13, 3 }
  0x25   : > { %s129_s16 = scalar_lea.sflag (!%p123_p11), [#allocation3], %s570_s13  ;;  %s132_s17 = scalar_lea.vmem (!%p123_p11), [#allocation2], %s284_s15 }
  0x29   : > { %441 = dma.done.wait (%p531_p8), %s129_s16, 128  }
  0x2a   : > { %443 = vsyncadd (%p531_p8), %s129_s16, 4294967168  ;;  %v153_v0 = vld [vmem:[%s132_s17] sm:$0xff]  ;;  %s285_s22 = sshll.u32 %s570_s13, 2  ;;  %s295_s25 = sshll.u32 %s462_s9, 6 }
  0x2b   : > { %v286_v1 = vmul.f32 -1.442695, %v153_v0  ;;  %s150_s23 = scalar_lea.vmem [#allocation5], %s285_s22  ;;  %s190_s27 = scalar_lea.hbm %s620_s1, %s295_s25 }
  0x2c   : > { %s192_s24 = sshll.u32 %s150_s23, 4  ;;  %s176_s28 = scalar_lea.sflag [#allocation4], %s570_s13  ;;  %s193_s24 = int_to_ptr.vmem [resolvable:$true] %s192_s24 }
  0x2d   : > { %358 = vpow2.f32 %v286_v1  ;;  %s390_s29 = scalar_lea.vmem %s193_s24, 64  ;;  %s473_s30 = smov [#allocation5]  }
  0x2e   : > { %p391_p8 = scmp.ne.s32.totalorder %s193_s24, %s390_s29  ;;  %s394_s2 = sshll.u32 %s473_s30, 4  ;;  %s395_s2 = int_to_ptr.vmem [resolvable:$false] %s394_s2 }
  0x2f   : > { %s396_s3 = scalar_lea.vmem %s395_s2, 128  ;;  %p397_p0 = scmp.lt.s32.totalorder %s193_s24, %s395_s2 }
  0x30   : > { %p392_p11 = pnand %p391_p8, %p535_p9  ;;  %p398_p1 = scmp.lt.s32.totalorder %s396_s3, %s390_s29 }
  0x32   : > { %p393_p12 = pneg %p392_p11  ;;  %p399_p2 = por %p398_p1, %p397_p0 }
  0x34   : > { %p400_p3 = pnand %p399_p2, %p393_p12 }
  0x3a   : > { %v359_v2 = vpop.eup %358 }
  0x3b   : > { %v157_v3 = vadd.f32 1.0, %v359_v2 }
  0x3d   : > { %360 = vrcp.f32 %v157_v3 }
  0x4a   : > { %v361_v4 = vpop.eup %360 }
  0x4b   : > { %v287_v5 = vrot.slane %v361_v4, 10 }
  0x4d   : > { %v164_v6 = vmul.f32 %v287_v5, %v153_v0 }
  0x4f   : > { %288 = vst.sshfl [vmem:[%s150_s23] sm:$0x33 pattern:$0x76325410] %v164_v6 }
  0x50   : > { %403 = shalt.err (!%p400_p3)
}
  0x51   : > { %s404_s9 = scalar_lea.hbm %s190_s27, 64  ;;  %s408_s12 = scalar_lea.hbm %s620_s1, 128 }
  0x52   : > { %p405_p5 = scmp.ne.s32.totalorder %s190_s27, %s404_s9  ;;  %p409_p10 = scmp.lt.s32.totalorder %s190_s27, %s620_s1 }
  0x53   : > { %p410_p4 = scmp.lt.s32.totalorder %s408_s12, %s404_s9 }
  0x54   : > { %p406_p6 = pnand %p405_p5, %p535_p9 }
  0x55   : > { %p411_p13 = por %p410_p4, %p409_p10 }
  0x56   : > { %p407_p7 = pneg %p406_p6 }
  0x58   : > { %p412_p8 = pnand %p411_p13, %p407_p7 }
  0x5a   : > { %415 = shalt.err (!%p412_p8)
}
  0x5b   : > { %298 = dma.vmem_to_hbm [thread:$0]  (%p535_p9), %s193_s24, 64, %s190_s27, %s176_s28  }
  0x5c PF: > { %s204_s16 = sand.u32 1, %s450_s6   ;;  %p626_p11 = scmp.ne.s32.totalorder %s624_s21, 0 }
  0x5d   : > { %p627_p12 = scmp.ge.s32.totalorder %s470_s11, 2  ;;  %s205_s17 = scalar_lea.sflag [#allocation4], %s204_s16 }
  0x5f   : > { %p305_p0 = pnand %p627_p12, %p626_p11 }
  0x61   : > { %p306_p1 = pneg %p305_p0 }
  0x63   : > { %445 = dma.done.wait (%p306_p1), %s205_s17, 64  }
  0x64   : > { %447 = vsyncadd (%p306_p1), %s205_s17, 4294967232  ;;  %s17_s11 = sadd.s32 1, %s470_s11   ;;  %s628_s6 = smov %s454_s7 }
  0x65   : > { %p14_p2 = scmp.ge.s32.totalorder %s17_s11, 4   ;;  %s629_s7 = smov %s458_s8 }
  0x66   : > { %s630_s8 = smov %s540_s20  ;;  %s631_s9 = smov %s466_s10 }
  0x67   : > { %s632_s10 = smov %s634_s14  ;;  %16 = sbr.rel (!%p14_p2) target bundleno = 6 (0x6), region = 69 }
  0x6c   :  { %210 = vsyncpa [#allocation3], 1 }
  0x6d   :  { %212 = vsyncpa [#allocation3 + $0x1], 1 }
  0x6e   :  { %213 = vsyncpa [#allocation4], 1 }
  0x6f   :  { %215 = vsyncpa [#allocation4 + $0x1], 1 }

</bundles_post_ra>
